<compile_context>
chip_gen: v5e
topology: v5e:2x2
jax: 0.10.0
libtpu: 0.0.40
codegen_flags: <defaults>
</compile_context>

<pallas_src>
import functools

import jax
import jax.numpy as jnp
from jax.experimental import pallas as pl
from jax.experimental.pallas import tpu as pltpu


def _contrastive_loss_kernel(d_ref, l_ref, out_ref, *, margin, block_rows,
                             n_blocks, blocks_per_core, n_true):
    c = pl.program_id(0)            # TensorCore split ("parallel")
    i = pl.program_id(1)            # row-block index within this core ("arbitrary")
    gb = c * blocks_per_core + i    # global row-block index (may be >= n_blocks)

    # Per-core (8,128) accumulator lives directly in the resident output block.
    @pl.when(i == 0)
    def _():
        out_ref[...] = jnp.zeros_like(out_ref)

    # Load in native dtype, compute in f32 on the VPU.
    d = d_ref[...].astype(jnp.float32)       # (block_rows, 128)
    lbl = l_ref[...].astype(jnp.float32)

    # labels*d^2 + (1-labels)*relu(margin-d)^2  ==  h^2 + labels*(d^2 - h^2)
    h = jnp.maximum(margin - d, 0.0)
    hh = h * h
    per_elem = hh + lbl * (d * d - hh)

    def fold(x):                              # (block_rows,128) -> (8,128)
        return x.reshape(-1, 8, 128).sum(axis=0)   # VPU-only vreg adds

    # Every block except the globally last real one is fully in-bounds:
    # accumulate unmasked (no iota/select on the hot path).
    @pl.when(gb < n_blocks - 1)
    def _():
        out_ref[...] += fold(per_elem)

    # Only the globally last real block may contain lane padding or OOB rows:
    # mask against the true element count there.
    # TODO(synk): gidx is int32; for n >= 2^31 elements switch to row-based masking.
    @pl.when(gb == n_blocks - 1)
    def _():
        row_id = jax.lax.broadcasted_iota(jnp.int32, per_elem.shape, 0)
        col_id = jax.lax.broadcasted_iota(jnp.int32, per_elem.shape, 1)
        gidx = (gb * block_rows + row_id) * 128 + col_id
        out_ref[...] += fold(jnp.where(gidx < n_true, per_elem, 0.0))
    # gb >= n_blocks (duplicate clamped step when n_blocks is odd): no-op.


def _sublane_multiple(dtype):
    bits = jnp.dtype(dtype).itemsize * 8
    return max(8, 256 // bits)      # 8 for 32-bit, 16 for 16-bit, 32 for 8-bit


def contrastive_loss(distances, labels, margin=1.0, block_rows=2048):
    """0.5 * mean(labels*d^2 + (1-labels)*relu(margin-d)^2), any input shape."""
    assert distances.shape == labels.shape
    n = int(distances.size)
    assert n > 0

    mult = max(_sublane_multiple(distances.dtype), _sublane_multiple(labels.dtype))

    d_flat = distances.reshape(-1)   # keep native dtype; cast in-kernel
    l_flat = labels.reshape(-1)

    if n % 128 == 0:
        rows = n // 128                              # zero-copy reshape path
    else:
        # TODO(synk): copy only the trailing <128-element sliver into a tiny
        # side buffer instead of re-writing both full arrays in HBM.
        rows = pl.cdiv(n, 128 * mult) * mult         # round rows up to sublane mult
        pad = rows * 128 - n
        d_flat = jnp.pad(d_flat, (0, pad))
        l_flat = jnp.pad(l_flat, (0, pad))

    d2 = d_flat.reshape(rows, 128)
    l2 = l_flat.reshape(rows, 128)

    # Row tile: sanitized to a multiple of the dtype-aware sublane packing,
    # capped by the (rounded-up) row count; default 2048 rows = 1 MiB f32 block.
    br = max(mult, (int(block_rows) // mult) * mult)
    tr = min(br, pl.cdiv(rows, mult) * mult)
    nb = pl.cdiv(rows, tr)        # total row-blocks
    nbp = pl.cdiv(nb, 2)          # row-blocks handled per TensorCore

    def row_block_map(c, i):
        # Clamp the (at most one) duplicate step when nb is odd; its
        # contribution is skipped inside the kernel.
        return (jnp.minimum(c * nbp + i, nb - 1), 0)

    kernel = functools.partial(
        _contrastive_loss_kernel, margin=float(margin), block_rows=tr,
        n_blocks=nb, blocks_per_core=nbp, n_true=n)

    out = pl.pallas_call(
        kernel,
        out_shape=jax.ShapeDtypeStruct((16, 128), jnp.float32),
        grid_spec=pltpu.PrefetchScalarGridSpec(
            num_scalar_prefetch=0,
            grid=(2, nbp),
            in_specs=[pl.BlockSpec((tr, 128), row_block_map),
                      pl.BlockSpec((tr, 128), row_block_map)],
            out_specs=pl.BlockSpec((8, 128), lambda c, i: (c, 0)),
        ),
        compiler_params=pltpu.CompilerParams(
            dimension_semantics=("parallel", "arbitrary"),
            vmem_limit_bytes=32 * 1024 * 1024,
        ),
    )(d2, l2)

    # Tiny (16,128) cross-lane finish + 0.5/n scale on the host-side graph.
    return 0.5 * jnp.sum(out) / n


def contrastive_loss_ref(distances, labels, margin=1.0):
    d = distances.astype(jnp.float32)
    lbl = labels.astype(jnp.float32)
    loss_sim = lbl * jnp.square(d)
    loss_dis = (1.0 - lbl) * jnp.square(jnp.maximum(margin - d, 0.0))
    return 0.5 * jnp.mean(loss_sim + loss_dis)


if __name__ == "__main__":
    key = jax.random.PRNGKey(0)
    k1, k2 = jax.random.split(key)
    # Small pairwise-distance batch: batch=2 x 100 pairs = 200 distances.
    batch, pairs = 2, 100
    distances = jax.random.uniform(k1, (batch, pairs), jnp.float32, 0.0, 2.0)
    labels = jax.random.bernoulli(k2, 0.5, (batch, pairs)).astype(jnp.float32)

    loss = contrastive_loss(distances, labels, margin=1.0)
    loss = jax.block_until_ready(loss)

    ref = contrastive_loss_ref(distances, labels, margin=1.0)
    assert jnp.allclose(loss, ref, rtol=1e-5, atol=1e-6), (loss, ref)
    print("KERNEL_OK")
</pallas_src>

<mosaic_0001>
module attributes {stable_mosaic.version = 11 : i64} {
  func.func @_contrastive_loss_kernel(%arg0: i32, %arg1: i32, %arg2: memref<8x128xf32, #tpu.memory_space<vmem>>, %arg3: memref<8x128xf32, #tpu.memory_space<vmem>>, %arg4: memref<8x128xf32, #tpu.memory_space<vmem>>) attributes {dimension_semantics = [#tpu.dimension_semantics<parallel>, #tpu.dimension_semantics<arbitrary>], iteration_bounds = array<i64: 2, 1>, scalar_prefetch = 0 : i64, scratch_operands = 0 : i64, tpu.core_type = #tpu.core_type<tc>, window_params = [{transform_indices = @transform_0, window_bounds = array<i64: 8, 128>}, {transform_indices = @transform_1, window_bounds = array<i64: 8, 128>}, {transform_indices = @transform_2, window_bounds = array<i64: 8, 128>}]} {
    %c1_i32 = arith.constant 1 : i32
    %0 = arith.muli %arg0, %c1_i32 : i32
    %1 = arith.addi %0, %arg1 : i32
    %c0_i32 = arith.constant 0 : i32
    %2 = arith.cmpi eq, %arg1, %c0_i32 : i32
    %3 = arith.extui %2 : i1 to i32
    %c0_i32_0 = arith.constant 0 : i32
    %4 = arith.cmpi ne, %3, %c0_i32_0 : i32
    scf.if %4 {
      %cst_9 = arith.constant 0.000000e+00 : f32
      %22 = vector.broadcast %cst_9 : f32 to vector<8x128xf32>
      %c0_10 = arith.constant 0 : index
      %c0_11 = arith.constant 0 : index
      %23 = vector.load %arg4[%c0_10, %c0_11] : memref<8x128xf32, #tpu.memory_space<vmem>>, vector<8x128xf32>
      tpu.vector_store %arg4[%c0_10, %c0_11], %22 {strides = array<i32>} : memref<8x128xf32, #tpu.memory_space<vmem>>, vector<8x128xf32>,
    } else {
    }
    %c0 = arith.constant 0 : index
    %c0_1 = arith.constant 0 : index
    %5 = vector.load %arg2[%c0, %c0_1] : memref<8x128xf32, #tpu.memory_space<vmem>>, vector<8x128xf32>
    %c0_2 = arith.constant 0 : index
    %c0_3 = arith.constant 0 : index
    %6 = vector.load %arg3[%c0_2, %c0_3] : memref<8x128xf32, #tpu.memory_space<vmem>>, vector<8x128xf32>
    %cst = arith.constant 1.000000e+00 : f32
    %7 = vector.broadcast %cst : f32 to vector<8x128xf32>
    %8 = arith.subf %7, %5 : vector<8x128xf32>
    %cst_4 = arith.constant 0.000000e+00 : f32
    %9 = vector.broadcast %cst_4 : f32 to vector<8x128xf32>
    %10 = arith.maximumf %8, %9 : vector<8x128xf32>
    %11 = arith.mulf %10, %10 : vector<8x128xf32>
    %12 = arith.mulf %5, %5 : vector<8x128xf32>
    %13 = arith.subf %12, %11 : vector<8x128xf32>
    %14 = arith.mulf %6, %13 : vector<8x128xf32>
    %15 = arith.addf %11, %14 : vector<8x128xf32>
    %c0_i32_5 = arith.constant 0 : i32
    %16 = arith.cmpi slt, %1, %c0_i32_5 : i32
    %17 = arith.extui %16 : i1 to i32
    %c0_i32_6 = arith.constant 0 : i32
    %18 = arith.cmpi ne, %17, %c0_i32_6 : i32
    scf.if %18 {
      %c0_9 = arith.constant 0 : index
      %c0_10 = arith.constant 0 : index
      %22 = vector.load %arg4[%c0_9, %c0_10] : memref<8x128xf32, #tpu.memory_space<vmem>>, vector<8x128xf32>
      %23 = vector.shape_cast %15 : vector<8x128xf32> to vector<1x8x128xf32>
      %cst_11 = arith.constant dense<0.000000e+00> : vector<8x128xf32>
      %24 = vector.multi_reduction <add>, %23, %cst_11 [0] : vector<1x8x128xf32> to vector<8x128xf32>
      %25 = arith.addf %22, %24 : vector<8x128xf32>
      %c0_12 = arith.constant 0 : index
      %c0_13 = arith.constant 0 : index
      %26 = vector.load %arg4[%c0_12, %c0_13] : memref<8x128xf32, #tpu.memory_space<vmem>>, vector<8x128xf32>
      tpu.vector_store %arg4[%c0_12, %c0_13], %25 {strides = array<i32>} : memref<8x128xf32, #tpu.memory_space<vmem>>, vector<8x128xf32>,
    } else {
    }
    %c0_i32_7 = arith.constant 0 : i32
    %19 = arith.cmpi eq, %1, %c0_i32_7 : i32
    %20 = arith.extui %19 : i1 to i32
    %c0_i32_8 = arith.constant 0 : i32
    %21 = arith.cmpi ne, %20, %c0_i32_8 : i32
    scf.if %21 {
      %22 = tpu.iota {dimensions = array<i32: 0>} : vector<8x128xi32>
      %23 = tpu.iota {dimensions = array<i32: 1>} : vector<8x128xi32>
      %c8_i32 = arith.constant 8 : i32
      %24 = arith.muli %1, %c8_i32 : i32
      %25 = vector.broadcast %24 : i32 to vector<8x128xi32>
      %26 = arith.addi %25, %22 : vector<8x128xi32>
      %c128_i32 = arith.constant 128 : i32
      %27 = vector.broadcast %c128_i32 : i32 to vector<8x128xi32>
      %28 = arith.muli %26, %27 : vector<8x128xi32>
      %29 = arith.addi %28, %23 : vector<8x128xi32>
      %c0_9 = arith.constant 0 : index
      %c0_10 = arith.constant 0 : index
      %30 = vector.load %arg4[%c0_9, %c0_10] : memref<8x128xf32, #tpu.memory_space<vmem>>, vector<8x128xf32>
      %c200_i32 = arith.constant 200 : i32
      %31 = vector.broadcast %c200_i32 : i32 to vector<8x128xi32>
      %32 = arith.cmpi slt, %29, %31 : vector<8x128xi32>
      %cst_11 = arith.constant 0.000000e+00 : f32
      %33 = vector.broadcast %cst_11 : f32 to vector<8x128xf32>
      %34 = arith.select %32, %15, %33 : vector<8x128xi1>, vector<8x128xf32>
      %35 = vector.shape_cast %34 : vector<8x128xf32> to vector<1x8x128xf32>
      %cst_12 = arith.constant dense<0.000000e+00> : vector<8x128xf32>
      %36 = vector.multi_reduction <add>, %35, %cst_12 [0] : vector<1x8x128xf32> to vector<8x128xf32>
      %37 = arith.addf %30, %36 : vector<8x128xf32>
      %c0_13 = arith.constant 0 : index
      %c0_14 = arith.constant 0 : index
      %38 = vector.load %arg4[%c0_13, %c0_14] : memref<8x128xf32, #tpu.memory_space<vmem>>, vector<8x128xf32>
      tpu.vector_store %arg4[%c0_13, %c0_14], %37 {strides = array<i32>} : memref<8x128xf32, #tpu.memory_space<vmem>>, vector<8x128xf32>,
    } else {
    }
    return
  }
  func.func @transform_0(%arg0: i32, %arg1: i32) -> (i32, i32) {
    %c1_i32 = arith.constant 1 : i32
    %0 = arith.muli %arg0, %c1_i32 : i32
    %1 = arith.addi %0, %arg1 : i32
    %c0_i32 = arith.constant 0 : i32
    %2 = arith.minsi %1, %c0_i32 : i32
    %c0_i32_0 = arith.constant 0 : i32
    %c0_i32_1 = arith.constant 0 : i32
    return %2, %c0_i32_0 : i32, i32
  }
  func.func @transform_1(%arg0: i32, %arg1: i32) -> (i32, i32) {
    %c1_i32 = arith.constant 1 : i32
    %0 = arith.muli %arg0, %c1_i32 : i32
    %1 = arith.addi %0, %arg1 : i32
    %c0_i32 = arith.constant 0 : i32
    %2 = arith.minsi %1, %c0_i32 : i32
    %c0_i32_0 = arith.constant 0 : i32
    %c0_i32_1 = arith.constant 0 : i32
    return %2, %c0_i32_0 : i32, i32
  }
  func.func @transform_2(%arg0: i32, %arg1: i32) -> (i32, i32) {
    %c0_i32 = arith.constant 0 : i32
    %c0_i32_0 = arith.constant 0 : i32
    return %arg0, %c0_i32 : i32, i32
  }
}

</mosaic_0001>

<bundles_post_ra>
// kernel: tpu_custom_call.1
= control target key start
LH: loop header
LB: loop body
LE: loop exit
PB: predicated region body
PF: predicated region fallthrough
CT: control target
= control target key end

     0   :  { %7 = vsyncpa [#allocation3], 0  ;;  %s876_s0 = inlined_call_operand.hbm [shape: f32[8,128], index: 0, kind: input, shape index: {}]   ;;  %s877_s1 = inlined_call_operand.hbm [shape: f32[8,128], index: 1, kind: input, shape index: {}]   ;;  %s878_s2 = inlined_call_operand.hbm [shape: f32[16,128], index: 2, kind: output, shape index: {}]  }
   0x1   :  { %9 = vsyncpa [#allocation3 + $0x1], 0 }
   0x2   :  { %10 = vsyncpa [#allocation6], 0 }
   0x3   :  { %12 = vsyncpa [#allocation6 + $0x1], 0 }
   0x4   :  { %13 = vsyncpa [#allocation4], 0 }
   0x5   :  { %15 = vsyncpa [#allocation4 + $0x1], 0  ;;  %s693_s9 = smov 0   ;;  %s695_s10 = smov 0  }
   0x6   :  { %s697_s11 = smov 0   ;;  %s699_s12 = smov 0  }
   0x7   :  { %s701_s13 = smov 0   ;;  %s703_s14 = smov 0  }
   0x8   :  { %s705_s15 = smov 0   ;;  %s707_s16 = smov 0  }
   0x9 LB: > { %s395_s17 = sadd.s32 4294967295, %s673_s16   ;;  %s396_s18 = sadd.s32 4294967294, %s673_s16   ;;  %s673_s16 = sphi %s707_s16, %s21_s16   ;;  %s669_s15 = sphi %s705_s15, %s890_s15   ;;  %s665_s14 = sphi %s703_s14, %s889_s14   ;;  %s661_s13 = sphi %s701_s13, %s866_s13   ;;  %s657_s12 = sphi %s699_s12, %s888_s12   ;;  %s653_s11 = sphi %s697_s11, %s887_s11   ;;  %s649_s10 = sphi %s695_s10, %s886_s10   ;;  %s645_s9 = sphi %s693_s9, %s885_s9  }
   0xa   : > { %s33_s19 = sadd.s32 1, %s669_s15  ;;  %p642_p1 = scmp.ne.s32.totalorder %s661_s13, 0 }
   0xb   : > { %p35_p0 = scmp.ge.s32.totalorder %s33_s19, 2  ;;  %p54_p2 = scmp.eq.s32.totalorder %s673_s16, 0 }
   0xc   : > { %p59_p3 = scmp.ne.s32.totalorder %s661_s13, %s657_s12  ;;  %p60_p5 = scmp.eq.s32.totalorder %s395_s17, 0 }
   0xd   : > { %s892_s19 = smov (%p35_p0, %s33_s19), 0  ;;  %p739_p4 = por %p642_p1, %p54_p2 }
   0xe   : > { %p743_p6 = por %p60_p5, %p59_p3  ;;  %s101_s22 = ssub.s32 %s669_s15, %s892_s19 }
   0xf   : > { %p102_p7 = scmp.eq.s32.totalorder %s101_s22, 0  ;;  %s104_s23 = sadd.s32 1, %s653_s11 }
  0x10   : > { %p114_p8 = scmp.ne.s32.totalorder %s653_s11, %s649_s10  ;;  %p115_p9 = scmp.eq.s32.totalorder %s395_s17, 1 }
  0x11   : > { %s751_s24 = scalar_select %p102_p7, %s653_s11, %s104_s23  }
  0x12   : > { %p120_p10 = scmp.ne.s32.totalorder %s649_s10, %s645_s9  ;;  %p121_p11 = scmp.eq.s32.totalorder %s396_s18, 1 }
  0x13   : > { %p757_p12 = por %p115_p9, %p114_p8  ;;  %p398_p13 = scmp.ge.s32.totalorder %s673_s16, 2 }
  0x14   : > { %p762_p0 = por %p121_p11, %p120_p10  ;;  %p431_p1 = scmp.lt.s32.totalorder %s673_s16, 2 }
  0x15   : > { %s154_s29 = sshll.u32 %s876_s0, 4  ;;  %s675_s30 = smov [#allocation2]   ;;  %s155_s29 = int_to_ptr.hbm [resolvable:$true] %s154_s29 }
  0x16   : > { %s156_s3 = sshll.u32 %s675_s30, 4  ;;  %p772_p2 = pnand %p431_p1, %p739_p4  ;;  %s157_s3 = int_to_ptr.vmem [resolvable:$true] %s156_s3 }
  0x17   : > { %p403_p3 = scmp.ge.s32.totalorder %s673_s16, 1  ;;  %p183_p5 = scmp.lt.s32.totalorder %s673_s16, 3 }
  0x18   : > { %s506_s5 = sshra.s32 %s155_s29, 4  ;;  %p510_p8 = pneg %p772_p2  ;;  %s507_s5 = int_to_ptr.hbm [resolvable:$true] %s506_s5 }
  0x19   : > { %s508_s6 = scalar_lea.hbm %s507_s5, 8  ;;  %s513_s12 = scalar_lea.hbm %s876_s0, 8 }
  0x1a   : > { %p509_p7 = scmp.ne.s32.totalorder %s507_s5, %s508_s6  ;;  %p515_p4 = scmp.lt.s32.totalorder %s513_s12, %s508_s6 }
  0x1c   : > { %p511_p9 = pnand %p510_p8, %p509_p7 }
  0x1e   : > { %p512_p10 = pneg %p511_p9 }
  0x20   : > { %p517_p11 = pnand %p515_p4, %p512_p10 }
  0x22   : > { %520 = shalt.err (!%p517_p11)
}
  0x23   : > { %423 = dma.hbm_to_vmem [thread:$0]  (!%p772_p2), %s155_s29, 128, %s157_s3, [#allocation3]  }
  0x24   : > { %p792_p1 = pnand %p403_p3, %p183_p5  ;;  %s176_s22 = sshll.u32 %s877_s1, 4  ;;  %s177_s22 = int_to_ptr.hbm [resolvable:$true] %s176_s22 }
  0x25   : > { %s676_s23 = smov [#allocation5]   ;;  %s536_s28 = sshra.s32 %s177_s22, 4  ;;  %s537_s28 = int_to_ptr.hbm [resolvable:$true] %s536_s28 }
  0x26   : > { %s178_s27 = sshll.u32 %s676_s23, 4  ;;  %s538_s30 = scalar_lea.hbm %s537_s28, 8  ;;  %s179_s27 = int_to_ptr.vmem [resolvable:$true] %s178_s27 }
  0x27   : > { %p539_p7 = scmp.ne.s32.totalorder %s537_s28, %s538_s30  ;;  %s543_s5 = scalar_lea.hbm %s877_s1, 8 }
  0x28   : > { %p545_p3 = scmp.lt.s32.totalorder %s543_s5, %s538_s30 }
  0x29   : > { %p541_p9 = pnand %p539_p7, %p510_p8 }
  0x2b   : > { %p542_p10 = pneg %p541_p9 }
  0x2d   : > { %p547_p5 = pnand %p545_p3, %p542_p10 }
  0x2f   : > { %550 = shalt.err (!%p547_p5)
}
  0x30   : > { %426 = dma.hbm_to_vmem [thread:$0]  (!%p772_p2), %s177_s22, 128, %s179_s27, [#allocation6]  }
  0x31   : > { %187 = sbr.rel (%p792_p1) target bundleno = 110 (0x6e), region = 28  ;;  %s189_s6 = sand.u32 (!%p792_p1), 1, %s661_s13  }
  0x32   : > { %s404_s7 = sshll.u32 (!%p792_p1), %s189_s6, 3  ;;  %s190_s8 = scalar_lea.sflag (!%p792_p1), [#allocation3], %s189_s6 }
  0x33   : > { %s193_s12 = scalar_lea.vmem (!%p792_p1), [#allocation2], %s404_s7 }
  0x36   : > { %631 = dma.done.wait (%p743_p6), %s190_s8, 128  }
  0x37   : > { %633 = vsyncadd (%p743_p6), %s190_s8, 4294967168  ;;  %s200_s18 = scalar_lea.sflag [#allocation6], %s189_s6  ;;  %s203_s20 = scalar_lea.vmem [#allocation5], %s404_s7 }
  0x38   : > { %635 = dma.done.wait (%p743_p6), %s200_s18, 128  }
  0x39   : > { %637 = vsyncadd (%p743_p6), %s200_s18, 4294967168  ;;  %s227_s4 = sand.u32 1, %s649_s10   ;;  %v677_v0 = vmov 0.0   ;;  %v242_v1 = vld [vmem:[%s193_s12] sm:$0xff]  ;;  %v243_v6 = vld [vmem:[%s203_s20] sm:$0xff]  ;;  %p407_p6 = scmp.ge.s32.totalorder %s665_s14, 0 }
  0x3a   : > { %s406_s17 = sshll.u32 %s227_s4, 3  ;;  %v244_v2 = vsub.f32 1.0, %v242_v1  ;;  %v247_v4 = vmul.f32 %v242_v1, %v242_v1 }
  0x3b   : > { %s821_s22 = scalar_lea.vmem [#allocation7], %s406_s17 }
  0x3c   : > { %241 = vst [vmem:[%s821_s22] sm:$0xff] %v677_v0  ;;  %v245_v3 = vmax.f32 %v244_v2, 0.0 }
  0x3e   : > { %v246_v5 = vmul.f32 %v245_v3, %v245_v3 }
  0x40   : > { %v248_v7 = vsub.f32 %v247_v4, %v246_v5  ;;  %254 = sbr.rel (%p407_p6) target bundleno = 73 (0x49), region = 44 }
  0x42   : > { %v249_v8 = vmul.f32 %v248_v7, %v243_v6 }
  0x44   : > { %v250_v9 = vadd.f32 %v249_v8, %v246_v5 }
  0x45   : > { %v255_v10 = vld [vmem:[%s821_s22] sm:$0xff] }
  0x46   : > { %v257_v11 = vadd.f32 %v255_v10, %v250_v9 }
  0x48   : > { %258 = vst [vmem:[%s821_s22] sm:$0xff] %v257_v11 }
  0x49 PF: > { %p408_p2 = scmp.ne.s32.totalorder %s665_s14, 0 }
  0x4a   : > { %s409_s21 = sshll.u32 (!%p408_p2), %s665_s14, 3 }
  0x4b   : > { %262 = sbr.rel (%p408_p2) target bundleno = 95 (0x5f), region = 48 }
  0x50   : > { %v263_v12 = vlaneseq  ;;  %v268_v13 = vstv %s409_s21  ;;  %v272_v19 = vld [vmem:[%s821_s22] sm:$0xff] }
  0x52   : > { %v264_v14 = vshrl.u32 %v263_v12, 7  ;;  %v266_v15 = vand.u32 127, %v263_v12 }
  0x54   : > { %v269_v16 = vadd.s32 %v268_v13, %v264_v14 }
  0x56   : > { %v270_v17 = vmul.u32 128, %v269_v16 }
  0x58   : > { %v271_v18 = vadd.s32 %v270_v17, %v266_v15 }
  0x5a   : > { %vm273_vm0 = vcmp.lt.s32.totalorder %v271_v18, 200 }
  0x5b   : > { %v274_v20 = vsel %vm273_vm0, %v250_v9, 0.0 }
  0x5c   : > { %v276_v21 = vadd.f32 %v274_v20, %v272_v19 }
  0x5e   : > { %277 = vst [vmem:[%s821_s22] sm:$0xff] %v276_v21 }
  0x5f PF: > { %s411_s23 = sshll.u32 %s665_s14, 3  ;;  %s291_s29 = sshll.u32 %s821_s22, 4  ;;  %s292_s29 = int_to_ptr.vmem [resolvable:$true] %s291_s29 }
  0x60   : > { %s289_s30 = scalar_lea.hbm %s878_s2, %s411_s23  ;;  %s279_s5 = scalar_lea.sflag [#allocation4], %s227_s4 }
  0x61   : > { %s293_s3 = sshll.u32 %s289_s30, 4  ;;  %s586_s14 = scalar_lea.hbm %s878_s2, 16  ;;  %s294_s3 = int_to_ptr.hbm [resolvable:$true] %s293_s3 }
  0x62   : > { %s580_s6 = sshra.s32 %s294_s3, 4  ;;  %s581_s6 = int_to_ptr.hbm [resolvable:$true] %s580_s6 }
  0x63   : > { %s582_s7 = scalar_lea.hbm %s581_s6, 8  ;;  %p587_p1 = scmp.lt.s32.totalorder %s581_s6, %s878_s2 }
  0x64   : > { %p583_p8 = scmp.ne.s32.totalorder %s581_s6, %s582_s7  ;;  %p588_p7 = scmp.lt.s32.totalorder %s586_s14, %s582_s7 }
  0x66   : > { %p584_p4 = pnand %p583_p8, %p757_p12  ;;  %p589_p9 = por %p588_p7, %p587_p1 }
  0x68   : > { %p585_p11 = pneg %p584_p4 }
  0x6a   : > { %p590_p10 = pnand %p589_p9, %p585_p11 }
  0x6c   : > { %593 = shalt.err (!%p590_p10)
}
  0x6d   : > { %418 = dma.vmem_to_hbm [thread:$0]  (%p757_p12), %s292_s29, 128, %s294_s3, %s279_s5  }
  0x6e PF: > { %s305_s4 = sand.u32 1, %s645_s9   ;;  %p428_p3 = pnand %p398_p13, %p762_p0 }
  0x6f   : > { %s306_s17 = scalar_lea.sflag [#allocation4], %s305_s4 }
  0x70   : > { %p429_p5 = pneg %p428_p3 }
  0x72   : > { %639 = dma.done.wait (%p429_p5), %s306_s17, 128  }
  0x73   : > { %641 = vsyncadd (%p429_p5), %s306_s17, 4294967168  ;;  %s21_s16 = sadd.s32 1, %s673_s16   ;;  %s885_s9 = smov %s649_s10 }
  0x74   : > { %p18_p6 = scmp.ge.s32.totalorder %s21_s16, 4   ;;  %s886_s10 = smov %s653_s11 }
  0x75   : > { %s887_s11 = smov %s751_s24  ;;  %s888_s12 = smov %s661_s13 }
  0x76   : > { %s866_s13 = smov 0   ;;  %s889_s14 = smov %s669_s15 }
  0x77   : > { %s890_s15 = smov %s892_s19  ;;  %20 = sbr.rel (!%p18_p6) target bundleno = 9 (0x9), region = 98 }
  0x7c   :  { %312 = vsyncpa [#allocation3], 1 }
  0x7d   :  { %314 = vsyncpa [#allocation3 + $0x1], 1 }
  0x7e   :  { %315 = vsyncpa [#allocation6], 1 }
  0x7f   :  { %317 = vsyncpa [#allocation6 + $0x1], 1 }
  0x80   :  { %318 = vsyncpa [#allocation4], 1 }
  0x81   :  { %320 = vsyncpa [#allocation4 + $0x1], 1 }

</bundles_post_ra>
